<compile_context>
chip_gen: v7x
topology: tpu7x:2x2x1
jax: 0.10.0
libtpu: 0.0.40
codegen_flags: <defaults>
</compile_context>

<pallas_src>
import jax
import jax.numpy as jnp
from jax import lax
from jax.experimental import pallas as pl
from jax.experimental.pallas import tpu as pltpu


def _sim_matrix_kernel(a_ref, b_ref, inv_a_ref, inv_b_ref, o_ref):
    # a_ref: (G, TI, D), b_ref: (G, TJ, D)
    # inv_a_ref: (G, TI, 1) f32, inv_b_ref: (G, 1, TJ) f32
    # o_ref: (G, TI, TJ)
    sim = lax.dot_general(
        a_ref[...], b_ref[...],
        dimension_numbers=(((2,), (2,)), ((0,), (0,))),
        preferred_element_type=jnp.float32,
    )                                                   # (G, TI, TJ) f32
    # Fold normalization in as a cheap broadcast post-scale (VPU, hidden
    # under the MXU drain). Norm vectors were precomputed wrapper-side.
    sim = sim * inv_a_ref[...] * inv_b_ref[...]
    o_ref[...] = sim.astype(o_ref.dtype)


def _round_up(x, m):
    return -(-x // m) * m


def _round_down(x, m):
    return (x // m) * m


def _physical_vmem_bytes():
    try:
        info = pltpu.get_tpu_info()
        cap = getattr(info, "vmem_capacity_bytes", None)
        if cap:
            return int(cap)
    except Exception:
        pass
    return 64 * 1024 * 1024   # conservative fallback (= v7x physical VMEM)


def sim_matrix(a, b, eps=1e-8, out_dtype=None, block_i=None, block_j=None):
    assert a.ndim == 4 and b.ndim == 4
    B, H, I, D = a.shape
    Bb, Hb, J, Db = b.shape
    assert (B, H, D) == (Bb, Hb, Db)
    out_dtype = a.dtype if out_dtype is None else out_dtype

    BH = B * H
    a2 = a.reshape(BH, I, D)
    b2 = b.reshape(BH, J, D)

    # ---- hoisted inverse L2 norms (computed once, f32) --------------------
    # 1/max(||x||, eps) == min(rsqrt(||x||^2), 1/eps); rsqrt(0)=inf clamps, so
    # this matches torch.clamp(norm, min=eps) exactly.
    inv_eps = jnp.float32(1.0 / eps)
    a32 = a2.astype(jnp.float32)
    b32 = b2.astype(jnp.float32)
    inv_a = jnp.minimum(
        lax.rsqrt(jnp.sum(a32 * a32, axis=-1, keepdims=True)), inv_eps
    )                                                   # (BH, I, 1)
    inv_b = jnp.minimum(
        lax.rsqrt(jnp.sum(b32 * b32, axis=-1)), inv_eps
    )[:, None, :]                                       # (BH, 1, J)

    # ---- VMEM-budget-aware tile / head-batch selection --------------------
    in_bytes = jnp.dtype(a.dtype).itemsize
    out_bytes = jnp.dtype(out_dtype).itemsize
    sub_align = {1: 32, 2: 16}.get(in_bytes, 8)         # sublane pack of dtype

    phys_vmem = _physical_vmem_bytes()
    vmem_limit = min(phys_vmem * 3 // 4, 112 * 1024 * 1024)
    block_budget = vmem_limit * 3 // 4

    def blocks_bytes(g, ti, tj):
        a_t = g * ti * D * in_bytes
        b_t = g * tj * D * in_bytes
        o_t = g * ti * tj * out_bytes
        ia_t = g * _round_up(ti, 8) * 128 * 4            # (ti,1) pads lanes->128
        ib_t = g * 8 * _round_up(tj, 128) * 4            # (1,tj) pads sublanes->8
        return 2 * (a_t + b_t + o_t + ia_t + ib_t)       # double-buffered

    ti_cap = 1024 if block_i is None else block_i
    tj_cap = 1024 if block_j is None else block_j
    TI = I if I <= ti_cap else max(sub_align, _round_down(ti_cap, sub_align))
    TJ = J if J <= tj_cap else max(128, _round_down(tj_cap, 128))
    # Shrink (keeping lane/sublane alignment legal) until we fit the budget.
    while blocks_bytes(1, TI, TJ) > block_budget:
        if TJ > 128 and TJ >= TI:
            TJ = max(128, _round_down(TJ // 2, 128))
        elif TI > sub_align:
            TI = max(sub_align, _round_down(TI // 2, sub_align))
        else:
            break

    nI = pl.cdiv(I, TI)
    nJ = pl.cdiv(J, TJ)

    # Batch G heads per grid step when the per-head problem is a single tile,
    # but always keep >= 2 grid steps (v7x has 2 TensorCores).
    G = 1
    if nI == 1 and nJ == 1:
        for cand in (256, 128, 64, 32, 16, 8, 4, 2):
            if (BH % cand == 0 and BH // cand >= 2
                    and blocks_bytes(cand, TI, TJ) <= block_budget):
                G = cand
                break

    grid = (BH // G, nI, nJ)

    out2 = pl.pallas_call(
        _sim_matrix_kernel,
        out_shape=jax.ShapeDtypeStruct((BH, I, J), out_dtype),
        grid_spec=pltpu.PrefetchScalarGridSpec(
            num_scalar_prefetch=0,
            grid=grid,
            in_specs=[
                # a-tile (and its norms) do not depend on j (innermost), so
                # they stay resident in VMEM across the whole j sweep.
                pl.BlockSpec((G, TI, D), lambda g, i, j: (g, i, 0)),
                pl.BlockSpec((G, TJ, D), lambda g, i, j: (g, j, 0)),
                pl.BlockSpec((G, TI, 1), lambda g, i, j: (g, i, 0)),
                pl.BlockSpec((G, 1, TJ), lambda g, i, j: (g, 0, j)),
            ],
            out_specs=pl.BlockSpec((G, TI, TJ), lambda g, i, j: (g, i, j)),
        ),
        compiler_params=pltpu.CompilerParams(
            dimension_semantics=("parallel", "parallel", "parallel"),
            vmem_limit_bytes=int(vmem_limit),
        ),
    )(a2, b2, inv_a, inv_b)

    return out2.reshape(B, H, I, J)


def sim_matrix_ref(a, b, eps=1e-8):
    a_n = jnp.linalg.norm(a, axis=-1, keepdims=True)
    b_n = jnp.linalg.norm(b, axis=-1, keepdims=True)
    a_norm = a / jnp.maximum(a_n, eps)
    b_norm = b / jnp.maximum(b_n, eps)
    return jnp.einsum("bhid,bhjd->bhij", a_norm, b_norm)


if __name__ == "__main__":
    key = jax.random.PRNGKey(0)
    ka, kb, kc, kd, ke, kf, kg, kh = jax.random.split(key, 8)

    # 1) Tiny per-head case — exercises head batching (G>1) with >= 2 grid steps.
    B, H, I, J, D = 2, 4, 8, 8, 32
    a = jax.random.normal(ka, (B, H, I, D), dtype=jnp.float32)
    b = jax.random.normal(kb, (B, H, J, D), dtype=jnp.float32)
    out = jax.block_until_ready(sim_matrix(a, b))
    ref = sim_matrix_ref(a, b)
    assert out.shape == (B, H, I, J)
    assert jnp.allclose(out, ref, atol=1e-5, rtol=1e-5), "small-shape mismatch"

    # 2) Larger per-head case — full-dim, lane-dense output tiles (one tile/head).
    B2, H2, I2, J2, D2 = 1, 2, 640, 768, 64
    a_big = jax.random.normal(kc, (B2, H2, I2, D2), dtype=jnp.float32)
    b_big = jax.random.normal(kd, (B2, H2, J2, D2), dtype=jnp.float32)
    out_big = jax.block_until_ready(sim_matrix(a_big, b_big))
    ref_big = sim_matrix_ref(a_big, b_big)
    assert out_big.shape == (B2, H2, I2, J2)
    assert jnp.allclose(out_big, ref_big, atol=1e-4, rtol=1e-4), "big-shape mismatch"

    # 3) Non-divisible dims with small block override — ragged last tiles on
    #    both I and J (replaces the old divisor-search fallback).
    B3, H3, I3, J3, D3 = 1, 1, 100, 200, 32
    a_rag = jax.random.normal(ke, (B3, H3, I3, D3), dtype=jnp.float32)
    b_rag = jax.random.normal(kf, (B3, H3, J3, D3), dtype=jnp.float32)
    out_rag = jax.block_until_ready(
        sim_matrix(a_rag, b_rag, block_i=64, block_j=128))
    ref_rag = sim_matrix_ref(a_rag, b_rag)
    assert out_rag.shape == (B3, H3, I3, J3)
    assert jnp.allclose(out_rag, ref_rag, atol=1e-5, rtol=1e-5), "ragged-shape mismatch"

    # 4) bf16 inputs — bf16 matmul operands + f32 norms/accumulation, bf16 output
    #    (halves writeback bytes).
    B4, H4, I4, J4, D4 = 1, 2, 128, 128, 64
    a_bf = jax.random.normal(kg, (B4, H4, I4, D4), dtype=jnp.bfloat16)
    b_bf = jax.random.normal(kh, (B4, H4, J4, D4), dtype=jnp.bfloat16)
    out_bf = jax.block_until_ready(sim_matrix(a_bf, b_bf))
    ref_bf = sim_matrix_ref(a_bf.astype(jnp.float32), b_bf.astype(jnp.float32))
    assert out_bf.dtype == jnp.bfloat16 and out_bf.shape == (B4, H4, I4, J4)
    assert jnp.allclose(out_bf.astype(jnp.float32), ref_bf, atol=3e-2, rtol=3e-2), \
        "bf16-shape mismatch"

    print("KERNEL_OK")
</pallas_src>

<mosaic_0001>
module attributes {stable_mosaic.version = 11 : i64} {
  func.func @_sim_matrix_kernel(%arg0: i32, %arg1: i32, %arg2: i32, %arg3: memref<4x8x32xf32, #tpu.memory_space<vmem>>, %arg4: memref<4x8x32xf32, #tpu.memory_space<vmem>>, %arg5: memref<4x8x1xf32, #tpu.memory_space<vmem>>, %arg6: memref<4x1x8xf32, #tpu.memory_space<vmem>>, %arg7: memref<4x8x8xf32, #tpu.memory_space<vmem>>) attributes {dimension_semantics = [#tpu.dimension_semantics<parallel>, #tpu.dimension_semantics<parallel>, #tpu.dimension_semantics<parallel>], iteration_bounds = array<i64: 2, 1, 1>, scalar_prefetch = 0 : i64, scratch_operands = 0 : i64, tpu.core_type = #tpu.core_type<tc>, window_params = [{transform_indices = @transform_0, window_bounds = array<i64: 4, 8, 32>}, {transform_indices = @transform_1, window_bounds = array<i64: 4, 8, 32>}, {transform_indices = @transform_2, window_bounds = array<i64: 4, 8, 1>}, {transform_indices = @transform_3, window_bounds = array<i64: 4, 1, 8>}, {transform_indices = @transform_4, window_bounds = array<i64: 4, 8, 8>}]} {
    %c0 = arith.constant 0 : index
    %c0_0 = arith.constant 0 : index
    %c0_1 = arith.constant 0 : index
    %0 = vector.load %arg3[%c0, %c0_0, %c0_1] : memref<4x8x32xf32, #tpu.memory_space<vmem>>, vector<4x8x32xf32>
    %c0_2 = arith.constant 0 : index
    %c0_3 = arith.constant 0 : index
    %c0_4 = arith.constant 0 : index
    %1 = vector.load %arg4[%c0_2, %c0_3, %c0_4] : memref<4x8x32xf32, #tpu.memory_space<vmem>>, vector<4x8x32xf32>
    %cst = arith.constant dense<0.000000e+00> : vector<4x8x8xf32>
    %2 = tpu.matmul %0, %1, %cst {dimension_numbers = #tpu.dot_dimension_numbers<[2], [2], [1], [1], [0, 0, 0, 1, 1, 1], [0], [0]>} : vector<4x8x32xf32>, vector<4x8x32xf32>, vector<4x8x8xf32> -> vector<4x8x8xf32>
    %c0_5 = arith.constant 0 : index
    %c0_6 = arith.constant 0 : index
    %c0_7 = arith.constant 0 : index
    %3 = vector.load %arg5[%c0_5, %c0_6, %c0_7] : memref<4x8x1xf32, #tpu.memory_space<vmem>>, vector<4x8x1xf32>
    %4 = vector.broadcast %3 : vector<4x8x1xf32> to vector<4x8x8xf32>
    %5 = arith.mulf %2, %4 : vector<4x8x8xf32>
    %c0_8 = arith.constant 0 : index
    %c0_9 = arith.constant 0 : index
    %c0_10 = arith.constant 0 : index
    %6 = vector.load %arg6[%c0_8, %c0_9, %c0_10] : memref<4x1x8xf32, #tpu.memory_space<vmem>>, vector<4x1x8xf32>
    %7 = vector.broadcast %6 : vector<4x1x8xf32> to vector<4x8x8xf32>
    %8 = arith.mulf %5, %7 : vector<4x8x8xf32>
    %c0_11 = arith.constant 0 : index
    %c0_12 = arith.constant 0 : index
    %c0_13 = arith.constant 0 : index
    %9 = vector.load %arg7[%c0_11, %c0_12, %c0_13] : memref<4x8x8xf32, #tpu.memory_space<vmem>>, vector<4x8x8xf32>
    tpu.vector_store %arg7[%c0_11, %c0_12, %c0_13], %8 {strides = array<i32>} : memref<4x8x8xf32, #tpu.memory_space<vmem>>, vector<4x8x8xf32>,
    return
  }
  func.func @transform_0(%arg0: i32, %arg1: i32, %arg2: i32) -> (i32, i32, i32) {
    %c0_i32 = arith.constant 0 : i32
    %c0_i32_0 = arith.constant 0 : i32
    return %arg0, %arg1, %c0_i32 : i32, i32, i32
  }
  func.func @transform_1(%arg0: i32, %arg1: i32, %arg2: i32) -> (i32, i32, i32) {
    %c0_i32 = arith.constant 0 : i32
    %c0_i32_0 = arith.constant 0 : i32
    return %arg0, %arg2, %c0_i32 : i32, i32, i32
  }
  func.func @transform_2(%arg0: i32, %arg1: i32, %arg2: i32) -> (i32, i32, i32) {
    %c0_i32 = arith.constant 0 : i32
    %c0_i32_0 = arith.constant 0 : i32
    return %arg0, %arg1, %c0_i32 : i32, i32, i32
  }
  func.func @transform_3(%arg0: i32, %arg1: i32, %arg2: i32) -> (i32, i32, i32) {
    %c0_i32 = arith.constant 0 : i32
    %c0_i32_0 = arith.constant 0 : i32
    return %arg0, %c0_i32, %arg2 : i32, i32, i32
  }
  func.func @transform_4(%arg0: i32, %arg1: i32, %arg2: i32) -> (i32, i32, i32) {
    %c0_i32 = arith.constant 0 : i32
    return %arg0, %arg1, %arg2 : i32, i32, i32
  }
}

</mosaic_0001>

<bundles_post_ra>
// kernel: tpu_custom_call.1
= control target key start
LH: loop header
LB: loop body
LE: loop exit
PB: predicated region body
PF: predicated region fallthrough
CT: control target
= control target key end

     0   :  { %9 = vsyncpa [#allocation3], 0  ;;  %s1355_s0 = inlined_call_operand.vmem [shape: f32[8,8,32], index: 0, kind: input, shape index: {}]   ;;  %s1356_s1 = inlined_call_operand.hbm [shape: f32[8,8,32], index: 1, kind: input, shape index: {}]   ;;  %s1357_s2 = inlined_call_operand.vmem [shape: f32[8,8,1], index: 2, kind: input, shape index: {}]   ;;  %s1358_s3 = inlined_call_operand.vmem [shape: f32[8,1,8], index: 3, kind: input, shape index: {}]   ;;  %s1359_s4 = inlined_call_operand.hbm [shape: f32[8,8,8], index: 4, kind: output, shape index: {}]  }
   0x1   :  { %11 = vsyncpa [#allocation3 + $0x1], 0 }
   0x2   :  { %12 = vsyncpa [#allocation4], 0 }
   0x3   :  { %14 = vsyncpa [#allocation4 + $0x1], 0  ;;  %s1146_s15 = smov 0   ;;  %s1148_s16 = smov 0  }
   0x4   :  { %s1150_s17 = smov 0   ;;  %s1152_s18 = smov 0  }
   0x5   :  { %s1154_s19 = smov 0   ;;  %s1156_s20 = smov 0  }
   0x6 LB: > { %s865_s21 = sadd.s32 4294967295, %s1110_s20   ;;  %s866_s22 = sadd.s32 4294967294, %s1110_s20   ;;  %s1110_s20 = sphi %s1156_s20, %s20_s20   ;;  %s1106_s19 = sphi %s1154_s19, %s1374_s19   ;;  %s1102_s18 = sphi %s1152_s18, %s1373_s18   ;;  %s1098_s17 = sphi %s1150_s17, %s1372_s17   ;;  %s1094_s16 = sphi %s1148_s16, %s1371_s16   ;;  %s1090_s15 = sphi %s1146_s15, %s1370_s15  }
   0x7   : > { %s39_s23 = sadd.s32 1, %s1106_s19  ;;  %s76_s24 = sadd.s32 1, %s1098_s17 }
   0x8   : > { %p41_p0 = scmp.ge.s32.totalorder %s39_s23, 2  ;;  %p83_p1 = scmp.ne.s32.totalorder %s1098_s17, %s1094_s16 }
   0x9   : > { %p84_p2 = scmp.eq.s32.totalorder %s1110_s20, 0  ;;  %p89_p3 = scmp.ne.s32.totalorder %s1094_s16, %s1090_s15 }
   0xa   : > { %s1376_s23 = smov (%p41_p0, %s39_s23), 0  ;;  %p90_p5 = scmp.eq.s32.totalorder %s865_s21, 0 }
   0xb   : > { %p1187_p4 = por %p84_p2, %p83_p1  ;;  %s71_s26 = ssub.s32 %s1106_s19, %s1376_s23 }
   0xc   : > { %p173_p6 = scmp.eq.s32.totalorder %s865_s21, 1  ;;  %p74_p7 = scmp.eq.s32.totalorder %s71_s26, 0 }
   0xd   : > { %p1193_p8 = por %p90_p5, %p89_p3  ;;  %p179_p10 = scmp.eq.s32.totalorder %s866_s22, 1 }
   0xe   : > { %p1197_p9 = por %p173_p6, %p83_p1  ;;  %p939_p13 = scmp.lt.s32.totalorder %s1110_s20, 2 }
   0xf   : > { %s1202_s29 = scalar_select %p74_p7, %s1098_s17, %s76_s24  }
  0x10   : > { %s1363_s28 = scalar_select %p1197_p9, 1, 0 }
  0x11   : > { %p1204_p11 = por %p179_p10, %p89_p3  ;;  %s211_s5 = sand.u32 1, %s1098_s17  }
  0x12   : > { %s869_s6 = sshll.u32 %s211_s5, 5  ;;  %s897_s7 = sshll.u32 %s1106_s19, 9 }
  0x13   : > { %s1364_s30 = scalar_select %p1204_p11, 1, 0 }
  0x14   : > { %s1215_s10 = scalar_lea.hbm %s1356_s1, %s897_s7  ;;  %s215_s11 = scalar_lea.vmem [#allocation2], %s869_s6 }
  0x15   : > { %s223_s12 = sshll.u32 %s215_s11, 4  ;;  %p1221_p0 = pnand %p939_p13, %p1187_p4  ;;  %s1217_s12 = int_to_ptr.vmem [resolvable:$true] %s223_s12 }
  0x16   : > { %s1226_s14 = scalar_lea.sflag [#allocation3], %s211_s5  ;;  %s998_s21 = scalar_lea.hbm %s1215_s10, 512 }
  0x17   : > { %p999_p2 = scmp.ne.s32.totalorder %s1215_s10, %s998_s21  ;;  %p1000_p3 = pneg %p1221_p0 }
  0x18   : > { %s1003_s25 = scalar_lea.hbm %s1356_s1, 1024  ;;  %p1004_p4 = scmp.lt.u32.totalorder %s1215_s10, %s1356_s1 }
  0x19   : > { %p1001_p5 = pnand %p1000_p3, %p999_p2  ;;  %p1005_p7 = scmp.lt.u32.totalorder %s1003_s25, %s998_s21 }
  0x1a   : > { %p1007_p13 = scmp.lt.u32.totalorder %s998_s21, %s1215_s10 }
  0x1b   : > { %p1002_p6 = pneg %p1001_p5  ;;  %p1006_p10 = por %p1005_p7, %p1004_p4 }
  0x1d   : > { %p1008_p12 = por %p1007_p13, %p1006_p10 }
  0x1f   : > { %p1009_p1 = pnand %p1008_p12, %p1002_p6 }
  0x21   : > { %1012 = shalt.err (!%p1009_p1)
}
  0x22   : > { %s1013_s5 = scalar_lea.vmem %s1217_s12, 512  ;;  %s1112_s7 = smov [#allocation2]  }
  0x23   : > { %p1014_p2 = scmp.ne.s32.totalorder %s1217_s12, %s1013_s5  ;;  %s1018_s8 = sshll.u32 %s1112_s7, 4  ;;  %s1019_s8 = int_to_ptr.vmem [resolvable:$false] %s1018_s8 }
  0x24   : > { %s1020_s9 = scalar_lea.vmem %s1019_s8, 1024  ;;  %p1021_p9 = scmp.lt.s32.totalorder %s1217_s12, %s1019_s8 }
  0x25   : > { %p1016_p5 = pnand %p1014_p2, %p1000_p3  ;;  %p1022_p4 = scmp.lt.s32.totalorder %s1020_s9, %s1013_s5 }
  0x27   : > { %p1017_p11 = pneg %p1016_p5  ;;  %p1023_p7 = por %p1022_p4, %p1021_p9 }
  0x29   : > { %p1024_p10 = pnand %p1023_p7, %p1017_p11 }
  0x2b   : > { %1027 = shalt.err (!%p1024_p10)
}
  0x2c   : > { %s1113_s11 = smov 128   ;;  %s1114_s21 = smov 8  }
  0x2d   : > { %934 = dma.hbm_to_vmem [thread:$0]  (!%p1221_p0), %s1215_s10, 512, %s1217_s12, %s1226_s14, %s1113_s11, %s1113_s11, %s1114_s21  }
  0x2e   : > { %p254_p12 = scmp.lt.s32.totalorder %s1110_s20, 3  ;;  %p1366_p1 = scmp.ge.s32.totalorder %s1110_s20, 1 }
  0x30   : > { %p255_p3 = pnand %p1366_p1, %p254_p12 }
  0x31   : > { %s1258_s22 = sand.u32 (!%p255_p3), 1, %s1094_s16  }
  0x32   : > { %258 = sbr.rel (%p255_p3) target bundleno = 301 (0x12d), region = 36  ;;  %s873_s24 = sshll.u32 (!%p255_p3), %s1258_s22, 5 }
  0x33   : > { %s261_s25 = scalar_lea.sflag (!%p255_p3), [#allocation3], %s1258_s22  ;;  %s264_s26 = scalar_lea.vmem (!%p255_p3), [#allocation2], %s873_s24 }
  0x39   : > { %1081 = dma.done.wait (%p1193_p8), %s261_s25, 512  }
  0x3a   : > { %1083 = vsyncadd (%p1193_p8), %s261_s25, 4294966784  ;;  %s875_s10 = sshll.u32 %s1102_s18, 2  ;;  %v1115_v0 = vmov 0.0   ;;  %vm1116_vm0 = vmmov 0   ;;  %v1117_v1 = vmov 0   ;;  %vm348_vm1 = vcmask 261120  }
  0x3b   : > { %907 = vmatprep.subr.mxu0 %v1115_v0  ;;  %912 = vmatprep.subr.mxu1 %v1115_v0  ;;  %p313_p9 = scmp.lt.s32.totalorder %s875_s10, 7  ;;  %v344_v2 = vld [vmem:[%s264_s26] sm:$0xff]  ;;  %v345_v3 = vld [vmem:[%s264_s26 + $0x8] sm:$0xff]  ;;  %v346_v6 = vld [vmem:[%s264_s26 + $0x10] sm:$0xff]  ;;  %vm713_vm2 = vcmask 64512   ;;  %s311_s21 = scalar_lea.vmem [#allocation5], %s873_s24 }
  0x3c   : > { %909 = vmatprep.mubr.msk.f32.mxu0 %vm1116_vm0, %v1115_v0  ;;  %914 = vmatprep.mubr.msk.f32.mxu1 %vm1116_vm0, %v1115_v0  ;;  %v347_v7 = vld [vmem:[%s264_s26 + $0x18] sm:$0xff]  ;;  %s734_s25 = sshll.u32 %s311_s21, 4  ;;  %s898_s26 = sshll.u32 %s1102_s18, 9  ;;  %s1298_s25 = int_to_ptr.vmem [resolvable:$true] %s734_s25 }
  0x3d   : > { %s1378_s10 = smov (!%p313_p9, %s875_s10), 7  ;;  %997 = vset.pattern.permute.xlu1 %v1117_v1  ;;  %996 = vset.pattern.permute.xlu0 %v1117_v1  ;;  %s1028_s12 = scalar_lea.vmem %s1298_s25, 512 }
  0x3e   : > { %s876_s27 = sshll.u32 %s1378_s10, 3  ;;  %908 = vmatpush3.xpose.msk.msra.mxu0 %vm348_vm1, %v344_v2  ;;  %913 = vmatpush3.xpose.msk.msra.mxu1 %vm348_vm1, %v345_v3  ;;  %s337_s11 = scalar_lea.vmem %s1358_s3, %s1378_s10 }
  0x3f   : > { %s319_s14 = scalar_lea.vmem %s1355_s0, %s876_s27  ;;  %s329_s7 = scalar_lea.vmem %s1357_s2, %s876_s27  ;;  %917 = vmatprep.subr.mxu0 %v1115_v0  ;;  %922 = vmatprep.subr.mxu1 %v1115_v0  ;;  %v888_v18 = vld [vmem:[%s337_s11] ss:$0 sm:$0xff]  ;;  %v889_v20 = vld [vmem:[%s337_s11 + $0x1] ss:$0 sm:$0xff]  ;;  %v890_v29 = vld [vmem:[%s337_s11 + $0x2] ss:$0 sm:$0xff] }
  0x40   : > { %v340_v4 = vld [vmem:[%s319_s14] sm:$0xff]  ;;  %v341_v5 = vld [vmem:[%s319_s14 + $0x8] sm:$0xff]  ;;  %v655_v8 = vld [vmem:[%s329_s7 + $0x10] sm:$0xff]  ;;  %s1304_s10 = scalar_lea.hbm %s1359_s4, %s898_s26  ;;  %s719_s27 = scalar_lea.sflag [#allocation4], %s1258_s22 }
  0x41   : > { %669 = vperm.xlu1 %997, %v655_v8   ;;  %910 = vmatmul.mubr.msk.f32.vlgmr.msra.gmra.mrb[0].mxu0 %vm348_vm1, %v340_v4  ;;  %v653_v9 = vld [vmem:[%s329_s7] sm:$0xff]  ;;  %v656_v10 = vld [vmem:[%s329_s7 + $0x18] sm:$0xff]  ;;  %v342_v11 = vld [vmem:[%s319_s14 + $0x10] sm:$0xff]  ;;  %p1029_p8 = scmp.ne.s32.totalorder %s1298_s25, %s1028_s12  ;;  %p1367_p11 = scmp.ne.s32.totalorder %s1363_s28, 0 }
  0x42   : > { %915 = vmatmul.mubr.msk.f32.vlgmr.msra.gmra.mrb[0].mxu1 %vm348_vm1, %v341_v5  ;;  %918 = vmatpush3.xpose.msk.msra.mxu0 %vm348_vm1, %v346_v6  ;;  %v343_v12 = vld [vmem:[%s319_s14 + $0x18] sm:$0xff]  ;;  %v654_v13 = vld [vmem:[%s329_s7 + $0x8] sm:$0xff]  ;;  %v891_v31 = vld [vmem:[%s337_s11 + $0x3] ss:$0 sm:$0xff]  ;;  %s1118_s13 = smov [#allocation5]  }
  0x43   : > { %923 = vmatpush3.xpose.msk.msra.mxu1 %vm348_vm1, %v347_v7  ;;  %919 = vmatprep.mubr.msk.f32.mxu0 %vm1116_vm0, %v1115_v0  ;;  %p1030_p0 = pnand %p1029_p8, %p1367_p11  ;;  %s1032_s14 = sshll.u32 %s1118_s13, 4  ;;  %s1033_s14 = int_to_ptr.vmem [resolvable:$false] %s1032_s14 }
  0x44   : > { %924 = vmatprep.mubr.msk.f32.mxu1 %vm1116_vm0, %v1115_v0  ;;  %659 = vperm.xlu0 %996, %v653_v9   ;;  %s1034_s6 = scalar_lea.vmem %s1033_s14, 1024  ;;  %p1035_p13 = scmp.lt.s32.totalorder %s1298_s25, %s1033_s14 }
  0x45   : > { %674 = vperm.xlu1 %997, %v656_v10   ;;  %920 = vmatmul.mubr.msk.f32.vlgmr.msra.gmra.mrb[2].mxu0 %vm348_vm1, %v342_v11  ;;  %p1031_p6 = pneg %p1030_p0  ;;  %p1036_p2 = scmp.lt.s32.totalorder %s1034_s6, %s1028_s12 }
  0x46   : > { %925 = vmatmul.mubr.msk.f32.vlgmr.msra.gmra.mrb[2].mxu1 %vm348_vm1, %v343_v12 }
  0x47   : > { %p1037_p5 = por %p1036_p2, %p1035_p13 }
  0x48   : > { %664 = vperm.xlu0 %996, %v654_v13  }
  0x49   : > { %p1038_p4 = pnand %p1037_p5, %p1031_p6 }
  0xc0   : > { %v670_v15 = vpop.permute.xlu1 %669 }
  0xc3   : > { %v660_v14 = vpop.permute.xlu0 %659 }
  0xc4   : > { %v675_v26 = vpop.permute.xlu1 %674 }
  0xc7   : > { %v665_v16 = vpop.permute.xlu0 %664 }
 0x114   : > { %v421_v17 = vpop.f32.mrb[0].mxu0 }
 0x115   : > { %v497_v19 = vpop.f32.mrb[0].mxu1  ;;  %v677_v21 = vmul.f32 %v660_v14, %v421_v17  ;;  %v911_v23 = vpop.f32.mrb[1].mxu0 }
 0x116   : > { %v678_v22 = vmul.f32 %v665_v16, %v497_v19  ;;  %v916_v24 = vpop.f32.mrb[1].mxu1 }
 0x117   : > { %v709_v25 = vmul.f32 %v888_v18, %v677_v21 }
 0x118   : > { %v710_v27 = vmul.f32 %v889_v20, %v678_v22  ;;  %v573_v28 = vpop.f32.mrb[2].mxu0 }
 0x119   : > { %v649_v30 = vpop.f32.mrb[2].mxu1  ;;  %714 = vst.msk [vmem:[%s311_s21] sm:$0xff] %vm713_vm2, %v709_v25  ;;  %v679_v32 = vmul.f32 %v670_v15, %v573_v28  ;;  %v921_v34 = vpop.f32.mrb[3].mxu0 }
 0x11a   : > { %715 = vst.msk [vmem:[%s311_s21 + $0x8] sm:$0xff] %vm713_vm2, %v710_v27  ;;  %v680_v33 = vmul.f32 %v675_v26, %v649_v30  ;;  %v926_v35 = vpop.f32.mrb[3].mxu1 }
 0x11b   : > { %v711_v36 = vmul.f32 %v890_v29, %v679_v32 }
 0x11c   : > { %v712_v37 = vmul.f32 %v891_v31, %v680_v33 }
 0x11d   : > { %716 = vst.msk [vmem:[%s311_s21 + $0x10] sm:$0xff] %vm713_vm2, %v711_v36 }
 0x11e   : > { %717 = vst.msk [vmem:[%s311_s21 + $0x18] sm:$0xff] %vm713_vm2, %v712_v37 }
 0x11f   : > { %1041 = shalt.err (!%p1038_p4)
}
 0x120   : > { %s1042_s5 = scalar_lea.hbm %s1304_s10, 512  ;;  %s1046_s9 = scalar_lea.hbm %s1359_s4, 1024 }
 0x121   : > { %p1043_p7 = scmp.ne.s32.totalorder %s1304_s10, %s1042_s5  ;;  %p1047_p1 = scmp.lt.u32.totalorder %s1304_s10, %s1359_s4 }
 0x122   : > { %p1048_p3 = scmp.lt.u32.totalorder %s1046_s9, %s1042_s5  ;;  %p1050_p8 = scmp.lt.u32.totalorder %s1042_s5, %s1304_s10 }
 0x123   : > { %p1044_p10 = pnand %p1043_p7, %p1367_p11 }
 0x124   : > { %p1049_p9 = por %p1048_p3, %p1047_p1 }
 0x125   : > { %p1045_p12 = pneg %p1044_p10 }
 0x126   : > { %p1051_p0 = por %p1050_p8, %p1049_p9 }
 0x128   : > { %p1052_p6 = pnand %p1051_p0, %p1045_p12 }
 0x12a   : > { %1055 = shalt.err (!%p1052_p6)
}
 0x12b   : > { %s1119_s26 = smov 128   ;;  %s1120_s18 = smov 8  }
 0x12c   : > { %929 = dma.vmem_to_hbm [thread:$0]  (%p1367_p11), %s1298_s25, 512, %s1304_s10, %s719_s27, %s1119_s26, %s1119_s26, %s1120_s18  }
 0x12d PF: > { %s749_s24 = sand.u32 1, %s1090_s15   ;;  %p1368_p13 = scmp.ne.s32.totalorder %s1364_s30, 0 }
 0x12e   : > { %p1369_p2 = scmp.ge.s32.totalorder %s1110_s20, 2  ;;  %s750_s12 = scalar_lea.sflag [#allocation4], %s749_s24 }
 0x130   : > { %p936_p5 = pnand %p1369_p2, %p1368_p13 }
 0x132   : > { %1085 = dma.done.wait (!%p936_p5), %s750_s12, 512  }
 0x133   : > { %1087 = vsyncadd (!%p936_p5), %s750_s12, 4294966784  ;;  %s20_s20 = sadd.s32 1, %s1110_s20   ;;  %s1370_s15 = smov %s1094_s16 }
 0x134   : > { %p17_p4 = scmp.ge.s32.totalorder %s20_s20, 4   ;;  %s1371_s16 = smov %s1098_s17 }
 0x135   : > { %s1372_s17 = smov %s1202_s29  ;;  %s1373_s18 = smov %s1106_s19 }
 0x136   : > { %s1374_s19 = smov %s1376_s23  ;;  %19 = sbr.rel (!%p17_p4) target bundleno = 6 (0x6), region = 90 }
 0x13d   :  { %755 = vsyncpa [#allocation3], 1 }
 0x13e   :  { %757 = vsyncpa [#allocation3 + $0x1], 1 }
 0x13f   :  { %758 = vsyncpa [#allocation4], 1 }
 0x140   :  { %760 = vsyncpa [#allocation4 + $0x1], 1 }

</bundles_post_ra>
